<compile_context>
chip_gen: v6e
topology: v6e:2x2x1
jax: 0.10.0
libtpu: 0.0.40
codegen_flags: <defaults>
</compile_context>

<pallas_src>
import functools

import jax
import jax.numpy as jnp
from jax.experimental import pallas as pl
from jax.experimental.pallas import tpu as pltpu

TB_MAX = 4096     # max batch-tile rows (VMEM budget ~8 MiB incl. double-buffering)
TB_SPLIT = 1024   # above this, force >=2 grid steps so v7x uses both TensorCores


def _binary_classifier_kernel(x_ref, w1_ref, b1_ref, w2_ref, b2_ref, out_ref):
    # x:  (TB, D_in)        w1: (D_in, H)      b1: (1, H)   f32
    # w2: (H, out_dim)      b2: (1, out_dim)   f32
    # out: (TB, out_dim)    f32   (out_dim = 2, logical width — no lane pad)
    # fc1: MXU matmul with f32 accumulation; bias add + ReLU in f32 on the VPU.
    h = jnp.dot(x_ref[...], w1_ref[...], preferred_element_type=jnp.float32)
    h = jnp.maximum(h + b1_ref[...], 0.0)
    # fc2: narrow output (out_dim columns). Store is masked (lane width < 128)
    # but HBM writeback is only out_dim * 4 B per row.
    h = h.astype(w2_ref.dtype)
    logits = jnp.dot(h, w2_ref[...], preferred_element_type=jnp.float32) + b2_ref[...]
    out_ref[...] = logits.astype(out_ref.dtype)


def prepare_params(w1, b1, w2, b2, use_bf16_mxu: bool = False):
    """One-time parameter prep (init time, NOT per forward call).

    Converts PyTorch-style (out, in) weights to (in, out) and reshapes biases
    to (1, out) rows. If use_bf16_mxu, weights are stored as bf16 once here
    (instead of re-casting inside the kernel every grid step). Biases stay f32.
    Returns arrays only (no Python ints) so the dict is jit-friendly.
    """
    wdt = jnp.bfloat16 if use_bf16_mxu else jnp.float32
    w1_t = jnp.transpose(w1).astype(wdt)                 # (d_in, H)
    w2_t = jnp.transpose(w2).astype(wdt)                 # (H, out_dim)
    b1_r = b1.reshape(1, -1).astype(jnp.float32)         # (1, H)
    b2_r = b2.reshape(1, -1).astype(jnp.float32)         # (1, out_dim)
    return {"w1_t": w1_t, "b1": b1_r, "w2_t": w2_t, "b2": b2_r}


def _round_up(n, m):
    return ((n + m - 1) // m) * m


def _pick_tile(batch: int) -> int:
    if batch > TB_MAX:
        return TB_MAX                                   # multiple of 8
    if batch > TB_SPLIT:
        # >=2 grid steps so megacore (v7x) can shard the batch axis.
        return _round_up(pl.cdiv(batch, 2), 8)
    return batch                                        # block dim == array dim (always legal)


@functools.partial(jax.jit, static_argnames=("use_bf16_mxu",))
def binary_classifier(x, params, use_bf16_mxu: bool = False):
    """x: (B, input_dim). params: output of prepare_params(). -> (B, 2) f32."""
    w1_t, b1_r = params["w1_t"], params["b1"]
    w2_t, b2_r = params["w2_t"], params["b2"]

    B, d_in = x.shape
    hdim = w1_t.shape[1]
    out_dim = w2_t.shape[1]
    assert w1_t.shape[0] == d_in and w2_t.shape[0] == hdim

    if use_bf16_mxu and x.dtype != jnp.bfloat16:
        # Best case is the producer already emitting bf16 (then this is a
        # no-op); casting at the boundary keeps the kernel's x read stream at
        # half width rather than casting after the f32 tile was already DMA'd.
        x = x.astype(jnp.bfloat16)

    tb = _pick_tile(B)
    grid_b = pl.cdiv(B, tb)   # no jnp.pad: Pallas masks the partial last block

    out = pl.pallas_call(
        _binary_classifier_kernel,
        out_shape=jax.ShapeDtypeStruct((B, out_dim), jnp.float32),
        grid=(grid_b,),
        in_specs=[
            # x streamed per batch tile (double-buffered by the pipeline).
            pl.BlockSpec((tb, d_in), lambda i: (i, 0)),
            # Weights / biases: constant index_map -> VMEM-resident across grid.
            pl.BlockSpec((d_in, hdim), lambda i: (0, 0)),
            pl.BlockSpec((1, hdim), lambda i: (0, 0)),
            pl.BlockSpec((hdim, out_dim), lambda i: (0, 0)),
            pl.BlockSpec((1, out_dim), lambda i: (0, 0)),
        ],
        out_specs=pl.BlockSpec((tb, out_dim), lambda i: (i, 0)),
        compiler_params=pltpu.CompilerParams(
            dimension_semantics=("parallel",),       # batch axis across TCs on v7x
            vmem_limit_bytes=32 * 1024 * 1024,       # explicit budget (v5e default is 16 MiB)
        ),
    )(x, w1_t, b1_r, w2_t, b2_r)
    return out


def reference(x, w1, b1, w2, b2):
    h = jnp.maximum(x @ w1.T + b1, 0.0)
    return h @ w2.T + b2


if __name__ == "__main__":
    # args.task_rep_dim = 16  -> input_dim = 32 ; args.rnn_hidden_dim = 32
    task_rep_dim = 16
    input_dim = task_rep_dim * 2      # 32
    embed_dim = 32
    out_dim = 2
    batch = 8

    key = jax.random.PRNGKey(0)
    kx, kw1, kb1, kw2, kb2 = jax.random.split(key, 5)

    x = jax.random.normal(kx, (batch, input_dim), dtype=jnp.float32)
    # PyTorch-style (out, in) weights.
    w1 = jax.random.normal(kw1, (embed_dim, input_dim), dtype=jnp.float32) * 0.1
    b1 = jax.random.normal(kb1, (embed_dim,), dtype=jnp.float32) * 0.1
    w2 = jax.random.normal(kw2, (out_dim, embed_dim), dtype=jnp.float32) * 0.1
    b2 = jax.random.normal(kb2, (out_dim,), dtype=jnp.float32) * 0.1

    ref = reference(x, w1, b1, w2, b2)

    # f32 path (exact vs reference).
    params_f32 = prepare_params(w1, b1, w2, b2, use_bf16_mxu=False)
    pred = binary_classifier(x, params_f32, use_bf16_mxu=False)
    jax.block_until_ready(pred)
    assert pred.shape == (batch, out_dim)
    assert jnp.allclose(pred, ref, atol=1e-5, rtol=1e-5), "f32 mismatch vs reference"

    # bf16-MXU path (boundary cast + bf16-resident weights; loose tolerance).
    params_bf16 = prepare_params(w1, b1, w2, b2, use_bf16_mxu=True)
    pred_bf16 = binary_classifier(x, params_bf16, use_bf16_mxu=True)
    jax.block_until_ready(pred_bf16)
    assert jnp.allclose(pred_bf16, ref, atol=5e-2, rtol=5e-2), "bf16 mismatch vs reference"

    # Ragged large batch: exercises the multi-step grid and the masked partial
    # last block (no jnp.pad, no trailing slice in the wrapper).
    big_b = 1030
    xb = jax.random.normal(kx, (big_b, input_dim), dtype=jnp.float32)
    pred_big = binary_classifier(xb, params_f32, use_bf16_mxu=False)
    jax.block_until_ready(pred_big)
    ref_big = reference(xb, w1, b1, w2, b2)
    assert pred_big.shape == (big_b, out_dim)
    assert jnp.allclose(pred_big, ref_big, atol=1e-4, rtol=1e-4), "ragged-batch mismatch"

    print("KERNEL_OK")
</pallas_src>

<mosaic_0001>
module attributes {stable_mosaic.version = 11 : i64} {
  func.func @_binary_classifier_kernel(%arg0: i32, %arg1: memref<8x32xf32, #tpu.memory_space<vmem>>, %arg2: memref<32x32xf32, #tpu.memory_space<vmem>>, %arg3: memref<1x32xf32, #tpu.memory_space<vmem>>, %arg4: memref<32x2xf32, #tpu.memory_space<vmem>>, %arg5: memref<1x2xf32, #tpu.memory_space<vmem>>, %arg6: memref<8x2xf32, #tpu.memory_space<vmem>>) attributes {dimension_semantics = [#tpu.dimension_semantics<parallel>], iteration_bounds = array<i64: 1>, scalar_prefetch = 0 : i64, scratch_operands = 0 : i64, tpu.core_type = #tpu.core_type<tc>, window_params = [{transform_indices = @transform_0, window_bounds = array<i64: 8, 32>}, {pipeline_mode = #tpu.pipeline_mode<synchronous>, transform_indices = @transform_1, window_bounds = array<i64: 32, 32>}, {pipeline_mode = #tpu.pipeline_mode<synchronous>, transform_indices = @transform_2, window_bounds = array<i64: 1, 32>}, {pipeline_mode = #tpu.pipeline_mode<synchronous>, transform_indices = @transform_3, window_bounds = array<i64: 32, 2>}, {pipeline_mode = #tpu.pipeline_mode<synchronous>, transform_indices = @transform_4, window_bounds = array<i64: 1, 2>}, {transform_indices = @transform_5, window_bounds = array<i64: 8, 2>}]} {
    %c0 = arith.constant 0 : index
    %c0_0 = arith.constant 0 : index
    %0 = vector.load %arg1[%c0, %c0_0] : memref<8x32xf32, #tpu.memory_space<vmem>>, vector<8x32xf32>
    %c0_1 = arith.constant 0 : index
    %c0_2 = arith.constant 0 : index
    %1 = vector.load %arg2[%c0_1, %c0_2] : memref<32x32xf32, #tpu.memory_space<vmem>>, vector<32x32xf32>
    %cst = arith.constant dense<0.000000e+00> : vector<8x32xf32>
    %2 = tpu.matmul %0, %1, %cst {dimension_numbers = #tpu.dot_dimension_numbers<[1], [0], [0], [1], [0, 0, 1, 1], [], []>} : vector<8x32xf32>, vector<32x32xf32>, vector<8x32xf32> -> vector<8x32xf32>
    %c0_3 = arith.constant 0 : index
    %c0_4 = arith.constant 0 : index
    %3 = vector.load %arg3[%c0_3, %c0_4] : memref<1x32xf32, #tpu.memory_space<vmem>>, vector<1x32xf32>
    %4 = vector.broadcast %3 : vector<1x32xf32> to vector<8x32xf32>
    %5 = arith.addf %2, %4 : vector<8x32xf32>
    %cst_5 = arith.constant 0.000000e+00 : f32
    %6 = vector.broadcast %cst_5 : f32 to vector<8x32xf32>
    %7 = arith.maximumf %5, %6 : vector<8x32xf32>
    %c0_6 = arith.constant 0 : index
    %c0_7 = arith.constant 0 : index
    %8 = vector.load %arg4[%c0_6, %c0_7] : memref<32x2xf32, #tpu.memory_space<vmem>>, vector<32x2xf32>
    %cst_8 = arith.constant dense<0.000000e+00> : vector<8x2xf32>
    %9 = tpu.matmul %7, %8, %cst_8 {dimension_numbers = #tpu.dot_dimension_numbers<[1], [0], [0], [1], [0, 0, 1, 1], [], []>} : vector<8x32xf32>, vector<32x2xf32>, vector<8x2xf32> -> vector<8x2xf32>
    %c0_9 = arith.constant 0 : index
    %c0_10 = arith.constant 0 : index
    %10 = vector.load %arg5[%c0_9, %c0_10] : memref<1x2xf32, #tpu.memory_space<vmem>>, vector<1x2xf32>
    %11 = vector.broadcast %10 : vector<1x2xf32> to vector<8x2xf32>
    %12 = arith.addf %9, %11 : vector<8x2xf32>
    %c0_11 = arith.constant 0 : index
    %c0_12 = arith.constant 0 : index
    %13 = vector.load %arg6[%c0_11, %c0_12] : memref<8x2xf32, #tpu.memory_space<vmem>>, vector<8x2xf32>
    tpu.vector_store %arg6[%c0_11, %c0_12], %12 {strides = array<i32>} : memref<8x2xf32, #tpu.memory_space<vmem>>, vector<8x2xf32>,
    return
  }
  func.func @transform_0(%arg0: i32) -> (i32, i32) {
    %c0_i32 = arith.constant 0 : i32
    %c0_i32_0 = arith.constant 0 : i32
    return %arg0, %c0_i32 : i32, i32
  }
  func.func @transform_1(%arg0: i32) -> (i32, i32) {
    %c0_i32 = arith.constant 0 : i32
    %c0_i32_0 = arith.constant 0 : i32
    %c0_i32_1 = arith.constant 0 : i32
    return %c0_i32, %c0_i32_0 : i32, i32
  }
  func.func @transform_2(%arg0: i32) -> (i32, i32) {
    %c0_i32 = arith.constant 0 : i32
    %c0_i32_0 = arith.constant 0 : i32
    %c0_i32_1 = arith.constant 0 : i32
    return %c0_i32, %c0_i32_0 : i32, i32
  }
  func.func @transform_3(%arg0: i32) -> (i32, i32) {
    %c0_i32 = arith.constant 0 : i32
    %c0_i32_0 = arith.constant 0 : i32
    %c0_i32_1 = arith.constant 0 : i32
    return %c0_i32, %c0_i32_0 : i32, i32
  }
  func.func @transform_4(%arg0: i32) -> (i32, i32) {
    %c0_i32 = arith.constant 0 : i32
    %c0_i32_0 = arith.constant 0 : i32
    %c0_i32_1 = arith.constant 0 : i32
    return %c0_i32, %c0_i32_0 : i32, i32
  }
  func.func @transform_5(%arg0: i32) -> (i32, i32) {
    %c0_i32 = arith.constant 0 : i32
    %c0_i32_0 = arith.constant 0 : i32
    return %arg0, %c0_i32 : i32, i32
  }
}

</mosaic_0001>

<bundles_post_ra>
// kernel: binary_classifier.1
= control target key start
LH: loop header
LB: loop body
LE: loop exit
PB: predicated region body
PF: predicated region fallthrough
CT: control target
= control target key end

     0   :  { %10 = vsyncpa [#allocation3], 0  ;;  %s271_s18 = smov [#allocation2]   ;;  %s342_s0 = inlined_call_operand.hbm [shape: f32[8,32], index: 0, kind: input, shape index: {}]   ;;  %s343_s1 = inlined_call_operand.vmem [shape: f32[32,32], index: 1, kind: input, shape index: {}]   ;;  %s344_s2 = inlined_call_operand.vmem [shape: f32[1,32], index: 2, kind: input, shape index: {}]   ;;  %s345_s3 = inlined_call_operand.vmem [shape: f32[32,2], index: 3, kind: input, shape index: {}]   ;;  %s346_s4 = inlined_call_operand.vmem [shape: f32[1,2], index: 4, kind: input, shape index: {}]   ;;  %s347_s5 = inlined_call_operand.vmem [shape: f32[8,2], index: 5, kind: output, shape index: {}]  }
   0x1   :  { %s17_s19 = sshll.u32 %s271_s18, 4  ;;  %s18_s19 = int_to_ptr.vmem [resolvable:$true] %s17_s19 }
   0x2   :  { %s257_s20 = scalar_lea.vmem %s18_s19, 128  ;;  %p262_p1 = scmp.lt.s32.totalorder %s18_s19, %s18_s19 }
   0x3   :  { %p258_p0 = scmp.ne.s32.totalorder %s18_s19, %s257_s20  ;;  %p263_p2 = scmp.lt.s32.totalorder %s257_s20, %s257_s20 }
   0x5   :  { %p264_p3 = por %p263_p2, %p262_p1 }
   0x7   :  { %p265_p4 = pnand %p264_p3, %p258_p0 }
   0x9   :  { %268 = shalt.err (!%p265_p4)
}
   0xa   :  { %20 = dma.hbm_to_vmem [thread:$0]  %s342_s0, 128, %s18_s19, [#allocation3]  }
   0xb   :  { %269 = dma.done.wait [#allocation3], 128  }
   0xc   :  { %270 = vsyncadd [#allocation3], 4294967168  ;;  %v272_v0 = vmov 0.0   ;;  %vm273_vm0 = vmmov 0   ;;  %v36_v1 = vld [vmem:[%s343_s1 + $0x18] sm:$0xff]  ;;  %v35_v2 = vld [vmem:[%s343_s1 + $0x10] sm:$0xff] }
   0xd   :  { %224 = vmatprep.subr.mxu0 %v272_v0  ;;  %232 = vmatprep.mubr.msk.f32.mxu0 %vm273_vm0, %v272_v0  ;;  %v122_v3 = vld [vmem:[%s345_s3 + $0x18] sm:$0xff]  ;;  %v34_v4 = vld [vmem:[%s343_s1 + $0x8] sm:$0xff]  ;;  %v33_v5 = vld [vmem:[%s343_s1] sm:$0xff]  ;;  %vm44_vm1 = vcmask 261120   ;;  %vm203_vm2 = vcmask 15360  }
   0xe   :  { %235 = vmatprep.subr.mxu1 %v272_v0  ;;  %243 = vmatprep.mubr.msk.f32.mxu1 %vm273_vm0, %v272_v0  ;;  %v32_v6 = vld [vmem:[#allocation2] sm:$0xff]  ;;  %v121_v7 = vld [vmem:[%s345_s3 + $0x10] sm:$0xff]  ;;  %v120_v8 = vld [vmem:[%s345_s3 + $0x8] sm:$0xff] }
   0xf   :  { %225 = vmatpush3.msra.mxu0 %v36_v1  ;;  %236 = vmatpush3.msra.mxu1 %v122_v3  ;;  %v119_v9 = vld [vmem:[%s345_s3] sm:$0xff] }
  0x10   :  { %226 = vmatprep.subr.mxu0 %v272_v0  ;;  %237 = vmatprep.subr.mxu1 %v272_v0  ;;  %v210_v10 = vld [vmem:[%s344_s2] ss:$0 sm:$0xff] }
  0x11   :  { %227 = vmatpush3.msra.mxu0 %v35_v2  ;;  %238 = vmatpush3.msra.mxu1 %v121_v7  ;;  %v212_v15 = vld [vmem:[%s346_s4] ss:$0 sm:$0xff] }
  0x12   :  { %228 = vmatprep.subr.mxu0 %v272_v0  ;;  %239 = vmatprep.subr.mxu1 %v272_v0 }
  0x13   :  { %229 = vmatpush3.msra.mxu0 %v34_v4  ;;  %240 = vmatpush3.msra.mxu1 %v120_v8 }
  0x14   :  { %230 = vmatprep.subr.mxu0 %v272_v0  ;;  %241 = vmatprep.subr.mxu1 %v272_v0 }
  0x15   :  { %231 = vmatpush3.msra.mxu0 %v33_v5  ;;  %242 = vmatpush3.msra.mxu1 %v119_v9 }
  0x16   :  { %233 = vmatmul.mubr.msk.f32.vlgmr.msra.gmra.mxu0 %vm44_vm1, %v32_v6 }
  0xd6   :  { %v114_v11 = vpop.f32.mrf.mxu0 }
  0xd7   :  { %v115_v12 = vadd.f32 %v210_v10, %v114_v11 }
  0xd8   :  { %v234_v13 = vpop.f32.mrf.mxu0 }
  0xd9   :  { %v118_v14 = vmax.f32 %v115_v12, 0.0 }
  0xdb   :  { %244 = vmatmul.mubr.msk.f32.vlgmr.msra.gmra.mxu1 %vm44_vm1, %v118_v14 }
 0x19b   :  { %v199_v16 = vpop.f32.mrf.mxu1 }
 0x19c   :  { %v200_v17 = vadd.f32 %v212_v15, %v199_v16 }
 0x19d   :  { %v245_v18 = vpop.f32.mrf.mxu1 }
 0x19e   :  { %204 = vst.msk [vmem:[%s347_s5] sm:$0xff] %vm203_vm2, %v200_v17 }
 0x19f   :  { %209 = vsyncpa [#allocation3], 1 }

</bundles_post_ra>
